<compile_context>
chip_gen: v7x
topology: tpu7x:2x2x1
jax: 0.10.0
libtpu: 0.0.40
codegen_flags: <defaults>
</compile_context>

<pallas_src>
import functools

import jax
import jax.numpy as jnp
from jax.experimental import pallas as pl
from jax.experimental.pallas import tpu as pltpu


# Preferred tiles (auto-adjusted to the problem dims below).
_ROW_TILE = 1024     # rows (B*S) per block; large => vocab weight streamed few times
_VOCAB_TILE = 256    # vocab cols per block; matches v6e/v7x 256-wide MXU
_HID_TILE = 512      # hidden cols per block in kernel 1

_SUB = 16            # sublane granule (bf16-safe)
_LANE = 128          # lane granule

_NEG_BIG = -1e30     # bias for padded vocab columns (exp underflows to 0)


def _round_up(x, m):
    return (x + m - 1) // m * m


def _choose_tile(dim, preferred, granule, min_blocks=1):
    """Largest tile <= preferred (multiple of `granule`, halving steps) such that
    padding `dim` up to a multiple of the tile wastes little, optionally keeping
    at least `min_blocks` blocks (v7x: 2 TensorCores on the parallel axis)."""
    t = max(granule, min(preferred, _round_up(dim, granule)))
    while t > granule:
        waste = _round_up(dim, t) - dim
        if waste * 8 <= dim or waste < granule:
            break
        t = max(granule, t // 2)
    while t > granule and _round_up(dim, t) // t < min_blocks:
        t = max(granule, t // 2)
    return t


def _pad2d(x, rows, cols, value=0):
    pr, pc = rows - x.shape[0], cols - x.shape[1]
    if pr == 0 and pc == 0:
        return x
    return jnp.pad(x, ((0, pr), (0, pc)), constant_values=value)


def _vmem_limit_bytes():
    # 25% headroom under physical VMEM: v7x 64 MiB -> 48 MiB, v5e/v6e 128 -> 96 MiB.
    try:
        cap = getattr(pltpu.get_tpu_info(), "vmem_capacity_bytes", None)
        if cap:
            return int(cap) * 3 // 4
    except Exception:
        pass
    return 48 * 1024 * 1024


# ----------------------------------------------------------------------------
# Kernel 1: full-K row-slab bf16 matmul + bias + gelu (hidden layer of the proxy)
# ----------------------------------------------------------------------------
def _dense_gelu_kernel(x_ref, w_ref, b_ref, o_ref):
    acc = jnp.dot(x_ref[...], w_ref[...], preferred_element_type=jnp.float32)
    # bias + gelu epilogue kept in f32 (no bf16 VPU/EUP on v5e).
    o_ref[...] = jax.nn.gelu(acc + b_ref[...], approximate=True).astype(o_ref.dtype)


def dense_gelu(x, w, b, *, tm, tn):
    """x:(M,K) bf16, w:(K,N) bf16, b:(1,N) f32 -> (M,N) bf16. Dims pre-padded."""
    M, K = x.shape
    N = w.shape[1]
    return pl.pallas_call(
        _dense_gelu_kernel,
        out_shape=jax.ShapeDtypeStruct((M, N), jnp.bfloat16),
        grid_spec=pltpu.PrefetchScalarGridSpec(
            num_scalar_prefetch=0,
            grid=(M // tm, N // tn),
            in_specs=[
                # full-K row slab; block index constant across j -> DMA'd once per i
                pl.BlockSpec((tm, K), lambda i, j: (i, 0)),
                pl.BlockSpec((K, tn), lambda i, j: (0, j)),
                pl.BlockSpec((1, tn), lambda i, j: (0, j)),
            ],
            out_specs=pl.BlockSpec((tm, tn), lambda i, j: (i, j)),
        ),
        compiler_params=pltpu.CompilerParams(
            dimension_semantics=("parallel", "parallel"),
            vmem_limit_bytes=_vmem_limit_bytes(),
        ),
    )(x, w, b)


# ----------------------------------------------------------------------------
# Kernel 2: vocab projection fused with shifted cross-entropy (online LSE).
# h slab is full-K and VMEM-resident across the vocab sweep; logits never hit HBM.
# ----------------------------------------------------------------------------
def _vocab_ce_kernel(h_ref, w_ref, b_ref, lab_ref, out_ref,
                     m_ref, l_ref, ll_ref, *, seq_len, m_actual, tm, tv):
    i = pl.program_id(0)     # row block
    j = pl.program_id(1)     # vocab tile
    nj = pl.num_programs(1)

    # Reset the running-LSE state at the start of each row block's vocab sweep.
    @pl.when(j == 0)
    def _():
        m_ref[...] = jnp.full_like(m_ref, -jnp.inf)
        l_ref[...] = jnp.zeros_like(l_ref)
        ll_ref[...] = jnp.zeros_like(ll_ref)

    # Full-K matmul for this vocab tile.  Padded vocab columns carry a -1e30
    # bias (set in the wrapper), so no per-element pad mask is needed here.
    logits = jnp.dot(h_ref[...], w_ref[...],
                     preferred_element_type=jnp.float32) + b_ref[...]

    # Label-logit pick folded into the same pass (single iota, reused nowhere else).
    col = jax.lax.broadcasted_iota(jnp.int32, logits.shape, 1) + j * tv
    ll_ref[...] += jnp.sum(
        jnp.where(col == lab_ref[...], logits, 0.0), axis=-1, keepdims=True)

    # Online logsumexp across vocab tiles.
    m_prev = m_ref[...]
    m_new = jnp.maximum(m_prev, jnp.max(logits, axis=-1, keepdims=True))
    l_ref[...] = jnp.exp(m_prev - m_new) * l_ref[...] + jnp.sum(
        jnp.exp(logits - m_new), axis=-1, keepdims=True)
    m_ref[...] = m_new

    @pl.when(j == nj - 1)
    def _():
        nll = m_ref[...] + jnp.log(l_ref[...]) - ll_ref[...]        # (tm, 1)
        row = jax.lax.broadcasted_iota(jnp.int32, (tm, 1), 0) + i * tm
        # Shift semantics: only tokens t < S-1 contribute; padded rows excluded.
        valid = (row < m_actual) & ((row % seq_len) != (seq_len - 1))
        nll = jnp.where(valid, nll, 0.0)
        # Lane-dense 128-wide store (avoids masked (tm, 1) partial stores).
        out_ref[...] = jnp.broadcast_to(nll, out_ref.shape)


def vocab_projection_ce(h, w, b, shifted_labels, *, seq_len, m_actual, tm, tv):
    """h:(M,K) bf16, w:(K,V) bf16, b:(1,V) f32 (padded cols = -1e30),
    shifted_labels:(M,1) int32.  Returns (M, 128) f32 per-token NLL broadcast
    along lanes (0 at masked rows)."""
    M, K = h.shape
    V = w.shape[1]
    kernel = functools.partial(_vocab_ce_kernel, seq_len=seq_len,
                               m_actual=m_actual, tm=tm, tv=tv)
    return pl.pallas_call(
        kernel,
        out_shape=jax.ShapeDtypeStruct((M, 128), jnp.float32),
        grid_spec=pltpu.PrefetchScalarGridSpec(
            num_scalar_prefetch=0,
            grid=(M // tm, V // tv),
            in_specs=[
                # full-K h slab; constant across j -> DMA'd once per row block
                pl.BlockSpec((tm, K), lambda i, j: (i, 0)),
                pl.BlockSpec((K, tv), lambda i, j: (0, j)),
                pl.BlockSpec((1, tv), lambda i, j: (0, j)),
                pl.BlockSpec((tm, 1), lambda i, j: (i, 0)),
            ],
            out_specs=pl.BlockSpec((tm, 128), lambda i, j: (i, 0)),
            scratch_shapes=[
                pltpu.VMEM((tm, 1), jnp.float32),    # running max
                pltpu.VMEM((tm, 1), jnp.float32),    # running sum(exp)
                pltpu.VMEM((tm, 1), jnp.float32),    # label logit
            ],
        ),
        compiler_params=pltpu.CompilerParams(
            dimension_semantics=("parallel", "arbitrary"),
            vmem_limit_bytes=_vmem_limit_bytes(),
        ),
    )(h, w, b, shifted_labels)


# ----------------------------------------------------------------------------
# TrainingModule.forward equivalent
# ----------------------------------------------------------------------------
def training_module_forward(params, input_ids, labels, *,
                            row_tile=_ROW_TILE, vocab_tile=_VOCAB_TILE,
                            hid_tile=_HID_TILE):
    B, S = input_ids.shape
    H = params["embed"].shape[1]
    Vo = params["w_out"].shape[1]
    M = B * S

    # Tiles first, then pad dims to multiples of the chosen tiles (so e.g. a
    # 32k vocab keeps tv=256 instead of collapsing to 128).
    tm = _choose_tile(M, row_tile, _SUB, min_blocks=2)   # >=2 row blocks for v7x TCs
    tn = _choose_tile(H, hid_tile, _LANE)
    tv = _choose_tile(Vo, vocab_tile, _LANE)
    M_pad = _round_up(M, tm)
    H_pad = _round_up(H, tn)
    V_pad = _round_up(Vo, tv)

    # glue: embedding lookup (plain JAX gather)
    x = jnp.take(params["embed"], input_ids, axis=0).reshape(M, H)
    x = _pad2d(x, M_pad, H_pad).astype(jnp.bfloat16)

    w_hid = _pad2d(params["w_hid"], H_pad, H_pad).astype(jnp.bfloat16)
    b_hid = _pad2d(params["b_hid"].reshape(1, H).astype(jnp.float32), 1, H_pad)
    w_out = _pad2d(params["w_out"], H_pad, V_pad).astype(jnp.bfloat16)
    # Padded vocab columns get a -1e30 bias: they never win the running max,
    # their exp() underflows to 0, and labels (< Vo) never select them, so the
    # kernel needs no vocab-pad mask at all.
    b_out = _pad2d(params["b_out"].reshape(1, Vo).astype(jnp.float32), 1, V_pad,
                   value=_NEG_BIG)

    # hidden layer (Pallas, bf16 MXU, f32 accumulate)
    h = dense_gelu(x, w_hid, b_hid, tm=tm, tn=tn)         # (M_pad, H_pad) bf16

    # shift: align labels[..., 1:] with logits[..., :-1, :]; dummy label at the
    # last position of each sequence (masked inside the kernel).
    shifted = jnp.concatenate(
        [labels[:, 1:], jnp.zeros((B, 1), labels.dtype)], axis=1).reshape(M)
    shifted = jnp.pad(shifted, (0, M_pad - M)).reshape(M_pad, 1).astype(jnp.int32)

    # vocab projection fused with cross-entropy (logits never materialized)
    nll = vocab_projection_ce(h, w_out, b_out, shifted,
                              seq_len=S, m_actual=M, tm=tm, tv=tv)
    return jnp.sum(nll[:, 0]) / (B * (S - 1))


# ----------------------------------------------------------------------------
# Pure-JAX reference (same bf16-input / f32-accumulate numerics) for verification
# ----------------------------------------------------------------------------
def reference_forward(params, input_ids, labels):
    x = jnp.take(params["embed"], input_ids, axis=0)              # (B,S,H) f32
    xb = x.astype(jnp.bfloat16)
    wb = params["w_hid"].astype(jnp.bfloat16)
    h = jax.nn.gelu(
        jnp.dot(xb, wb, preferred_element_type=jnp.float32) + params["b_hid"],
        approximate=True)
    hb = h.astype(jnp.bfloat16)
    wo = params["w_out"].astype(jnp.bfloat16)
    logits = jnp.dot(hb, wo, preferred_element_type=jnp.float32) + params["b_out"]
    sl = logits[:, :-1, :]
    tl = labels[:, 1:]
    logp = jax.nn.log_softmax(sl, axis=-1)
    nll = -jnp.take_along_axis(logp, tl[..., None], axis=-1)[..., 0]
    return jnp.mean(nll)


if __name__ == "__main__":
    def run_case(B, S, H, V, seed, **tile_kw):
        key = jax.random.PRNGKey(seed)
        k_emb, k_wh, k_wo, k_in, k_lab = jax.random.split(key, 5)
        params = {
            "embed": jax.random.normal(k_emb, (V, H), jnp.float32) * 0.02,
            "w_hid": jax.random.normal(k_wh, (H, H), jnp.float32) * 0.1,
            "b_hid": jax.random.normal(jax.random.fold_in(k_wh, 1), (H,), jnp.float32) * 0.02,
            "w_out": jax.random.normal(k_wo, (H, V), jnp.float32) * 0.1,
            "b_out": jax.random.normal(jax.random.fold_in(k_wo, 1), (V,), jnp.float32) * 0.02,
        }
        input_ids = jax.random.randint(k_in, (B, S), 0, V, dtype=jnp.int32)
        labels = jax.random.randint(k_lab, (B, S), 0, V, dtype=jnp.int32)

        fwd = jax.jit(functools.partial(training_module_forward, **tile_kw))
        loss = jax.block_until_ready(fwd(params, input_ids, labels))
        ref = reference_forward(params, input_ids, labels)
        assert jnp.allclose(loss, ref, rtol=2e-3, atol=2e-3), (B, S, H, V, loss, ref)

    # Case 1: toy shapes (single-tile path).
    run_case(2, 8, 32, 256, seed=0)
    # Case 2: force the multi-tile path at small sizes — multiple row blocks,
    # multiple vocab tiles with padded columns, padded rows and padded hidden —
    # exercising the online-LSE resets, the -1e30 pad-bias masking, and the
    # shift/row masking on the tiled path (review correctness concern).
    run_case(2, 15, 96, 500, seed=1, row_tile=16, vocab_tile=128, hid_tile=128)

    print("KERNEL_OK")
</pallas_src>

<mosaic_0001>
module attributes {stable_mosaic.version = 11 : i64} {
  func.func @_dense_gelu_kernel(%arg0: i32, %arg1: i32, %arg2: memref<16x128xbf16, #tpu.memory_space<vmem>>, %arg3: memref<128x128xbf16, #tpu.memory_space<vmem>>, %arg4: memref<1x128xf32, #tpu.memory_space<vmem>>, %arg5: memref<16x128xbf16, #tpu.memory_space<vmem>>) attributes {dimension_semantics = [#tpu.dimension_semantics<parallel>, #tpu.dimension_semantics<parallel>], iteration_bounds = array<i64: 1, 1>, scalar_prefetch = 0 : i64, scratch_operands = 0 : i64, tpu.core_type = #tpu.core_type<tc>, window_params = [{transform_indices = @transform_0, window_bounds = array<i64: 16, 128>}, {transform_indices = @transform_1, window_bounds = array<i64: 128, 128>}, {transform_indices = @transform_2, window_bounds = array<i64: 1, 128>}, {transform_indices = @transform_3, window_bounds = array<i64: 16, 128>}]} {
    %c0 = arith.constant 0 : index
    %c0_0 = arith.constant 0 : index
    %0 = vector.load %arg2[%c0, %c0_0] : memref<16x128xbf16, #tpu.memory_space<vmem>>, vector<16x128xbf16>
    %c0_1 = arith.constant 0 : index
    %c0_2 = arith.constant 0 : index
    %1 = vector.load %arg3[%c0_1, %c0_2] : memref<128x128xbf16, #tpu.memory_space<vmem>>, vector<128x128xbf16>
    %cst = arith.constant dense<0.000000e+00> : vector<16x128xf32>
    %2 = tpu.matmul %0, %1, %cst {dimension_numbers = #tpu.dot_dimension_numbers<[1], [0], [0], [1], [0, 0, 1, 1], [], []>} : vector<16x128xbf16>, vector<128x128xbf16>, vector<16x128xf32> -> vector<16x128xf32>
    %c0_3 = arith.constant 0 : index
    %c0_4 = arith.constant 0 : index
    %3 = vector.load %arg4[%c0_3, %c0_4] : memref<1x128xf32, #tpu.memory_space<vmem>>, vector<1x128xf32>
    %4 = vector.broadcast %3 : vector<1x128xf32> to vector<16x128xf32>
    %5 = arith.addf %2, %4 : vector<16x128xf32>
    %6 = arith.mulf %5, %5 : vector<16x128xf32>
    %7 = arith.mulf %5, %6 : vector<16x128xf32>
    %cst_5 = arith.constant 4.471500e-02 : f32
    %8 = vector.broadcast %cst_5 : f32 to vector<16x128xf32>
    %9 = arith.mulf %8, %7 : vector<16x128xf32>
    %10 = arith.addf %5, %9 : vector<16x128xf32>
    %cst_6 = arith.constant 0.797884583 : f32
    %11 = vector.broadcast %cst_6 : f32 to vector<16x128xf32>
    %12 = arith.mulf %11, %10 : vector<16x128xf32>
    %13 = math.tanh %12 : vector<16x128xf32>
    %cst_7 = arith.constant 1.000000e+00 : f32
    %14 = vector.broadcast %cst_7 : f32 to vector<16x128xf32>
    %15 = arith.addf %14, %13 : vector<16x128xf32>
    %cst_8 = arith.constant 5.000000e-01 : f32
    %16 = vector.broadcast %cst_8 : f32 to vector<16x128xf32>
    %17 = arith.mulf %16, %15 : vector<16x128xf32>
    %18 = arith.mulf %5, %17 : vector<16x128xf32>
    %19 = arith.truncf %18 : vector<16x128xf32> to vector<16x128xbf16>
    %c0_9 = arith.constant 0 : index
    %c0_10 = arith.constant 0 : index
    %20 = vector.load %arg5[%c0_9, %c0_10] : memref<16x128xbf16, #tpu.memory_space<vmem>>, vector<16x128xbf16>
    tpu.vector_store %arg5[%c0_9, %c0_10], %19 {strides = array<i32>} : memref<16x128xbf16, #tpu.memory_space<vmem>>, vector<16x128xbf16>,
    return
  }
  func.func @transform_0(%arg0: i32, %arg1: i32) -> (i32, i32) {
    %c0_i32 = arith.constant 0 : i32
    %c0_i32_0 = arith.constant 0 : i32
    return %arg0, %c0_i32 : i32, i32
  }
  func.func @transform_1(%arg0: i32, %arg1: i32) -> (i32, i32) {
    %c0_i32 = arith.constant 0 : i32
    %c0_i32_0 = arith.constant 0 : i32
    return %c0_i32, %arg1 : i32, i32
  }
  func.func @transform_2(%arg0: i32, %arg1: i32) -> (i32, i32) {
    %c0_i32 = arith.constant 0 : i32
    %c0_i32_0 = arith.constant 0 : i32
    return %c0_i32, %arg1 : i32, i32
  }
  func.func @transform_3(%arg0: i32, %arg1: i32) -> (i32, i32) {
    %c0_i32 = arith.constant 0 : i32
    return %arg0, %arg1 : i32, i32
  }
}

module attributes {stable_mosaic.version = 11 : i64} {
  func.func @_vocab_ce_kernel(%arg0: i32, %arg1: i32, %arg2: memref<16x128xbf16, #tpu.memory_space<vmem>>, %arg3: memref<128x256xbf16, #tpu.memory_space<vmem>>, %arg4: memref<1x256xf32, #tpu.memory_space<vmem>>, %arg5: memref<16x1xi32, #tpu.memory_space<vmem>>, %arg6: memref<16x128xf32, #tpu.memory_space<vmem>>, %arg7: memref<16x1xf32, #tpu.memory_space<vmem>>, %arg8: memref<16x1xf32, #tpu.memory_space<vmem>>, %arg9: memref<16x1xf32, #tpu.memory_space<vmem>>) attributes {dimension_semantics = [#tpu.dimension_semantics<parallel>, #tpu.dimension_semantics<arbitrary>], iteration_bounds = array<i64: 1, 1>, scalar_prefetch = 0 : i64, scratch_operands = 3 : i64, tpu.core_type = #tpu.core_type<tc>, window_params = [{transform_indices = @transform_0, window_bounds = array<i64: 16, 128>}, {transform_indices = @transform_1, window_bounds = array<i64: 128, 256>}, {transform_indices = @transform_2, window_bounds = array<i64: 1, 256>}, {transform_indices = @transform_3, window_bounds = array<i64: 16, 1>}, {transform_indices = @transform_4, window_bounds = array<i64: 16, 128>}]} {
    %c0_i32 = arith.constant 0 : i32
    %0 = arith.cmpi eq, %arg1, %c0_i32 : i32
    %1 = arith.extui %0 : i1 to i32
    %c0_i32_0 = arith.constant 0 : i32
    %2 = arith.cmpi ne, %1, %c0_i32_0 : i32
    scf.if %2 {
      %cst_26 = arith.constant 0xFF800000 : f32
      %42 = vector.broadcast %cst_26 : f32 to vector<16x1xf32>
      %c0_27 = arith.constant 0 : index
      %c0_28 = arith.constant 0 : index
      %43 = vector.load %arg7[%c0_27, %c0_28] : memref<16x1xf32, #tpu.memory_space<vmem>>, vector<16x1xf32>
      tpu.vector_store %arg7[%c0_27, %c0_28], %42 {strides = array<i32>} : memref<16x1xf32, #tpu.memory_space<vmem>>, vector<16x1xf32>,
      %cst_29 = arith.constant 0.000000e+00 : f32
      %44 = vector.broadcast %cst_29 : f32 to vector<16x1xf32>
      %c0_30 = arith.constant 0 : index
      %c0_31 = arith.constant 0 : index
      %45 = vector.load %arg8[%c0_30, %c0_31] : memref<16x1xf32, #tpu.memory_space<vmem>>, vector<16x1xf32>
      tpu.vector_store %arg8[%c0_30, %c0_31], %44 {strides = array<i32>} : memref<16x1xf32, #tpu.memory_space<vmem>>, vector<16x1xf32>,
      %cst_32 = arith.constant 0.000000e+00 : f32
      %46 = vector.broadcast %cst_32 : f32 to vector<16x1xf32>
      %c0_33 = arith.constant 0 : index
      %c0_34 = arith.constant 0 : index
      %47 = vector.load %arg9[%c0_33, %c0_34] : memref<16x1xf32, #tpu.memory_space<vmem>>, vector<16x1xf32>
      tpu.vector_store %arg9[%c0_33, %c0_34], %46 {strides = array<i32>} : memref<16x1xf32, #tpu.memory_space<vmem>>, vector<16x1xf32>,
    } else {
    }
    %c0 = arith.constant 0 : index
    %c0_1 = arith.constant 0 : index
    %3 = vector.load %arg2[%c0, %c0_1] : memref<16x128xbf16, #tpu.memory_space<vmem>>, vector<16x128xbf16>
    %c0_2 = arith.constant 0 : index
    %c0_3 = arith.constant 0 : index
    %4 = vector.load %arg3[%c0_2, %c0_3] : memref<128x256xbf16, #tpu.memory_space<vmem>>, vector<128x256xbf16>
    %cst = arith.constant dense<0.000000e+00> : vector<16x256xf32>
    %5 = tpu.matmul %3, %4, %cst {dimension_numbers = #tpu.dot_dimension_numbers<[1], [0], [0], [1], [0, 0, 1, 1], [], []>} : vector<16x128xbf16>, vector<128x256xbf16>, vector<16x256xf32> -> vector<16x256xf32>
    %c0_4 = arith.constant 0 : index
    %c0_5 = arith.constant 0 : index
    %6 = vector.load %arg4[%c0_4, %c0_5] : memref<1x256xf32, #tpu.memory_space<vmem>>, vector<1x256xf32>
    %7 = vector.broadcast %6 : vector<1x256xf32> to vector<16x256xf32>
    %8 = arith.addf %5, %7 : vector<16x256xf32>
    %9 = tpu.iota {dimensions = array<i32: 1>} : vector<16x256xi32>
    %c256_i32 = arith.constant 256 : i32
    %10 = arith.muli %arg1, %c256_i32 : i32
    %11 = vector.broadcast %10 : i32 to vector<16x256xi32>
    %12 = arith.addi %9, %11 : vector<16x256xi32>
    %c0_6 = arith.constant 0 : index
    %c0_7 = arith.constant 0 : index
    %13 = vector.load %arg9[%c0_6, %c0_7] : memref<16x1xf32, #tpu.memory_space<vmem>>, vector<16x1xf32>
    %c0_8 = arith.constant 0 : index
    %c0_9 = arith.constant 0 : index
    %14 = vector.load %arg5[%c0_8, %c0_9] : memref<16x1xi32, #tpu.memory_space<vmem>>, vector<16x1xi32>
    %15 = vector.broadcast %14 : vector<16x1xi32> to vector<16x256xi32>
    %16 = arith.cmpi eq, %12, %15 : vector<16x256xi32>
    %cst_10 = arith.constant 0.000000e+00 : f32
    %17 = vector.broadcast %cst_10 : f32 to vector<16x256xf32>
    %18 = arith.select %16, %8, %17 : vector<16x256xi1>, vector<16x256xf32>
    %cst_11 = arith.constant dense<0.000000e+00> : vector<16xf32>
    %19 = vector.multi_reduction <add>, %18, %cst_11 [1] : vector<16x256xf32> to vector<16xf32>
    %20 = vector.shape_cast %19 : vector<16xf32> to vector<16x1xf32>
    %21 = arith.addf %13, %20 : vector<16x1xf32>
    %c0_12 = arith.constant 0 : index
    %c0_13 = arith.constant 0 : index
    %22 = vector.load %arg9[%c0_12, %c0_13] : memref<16x1xf32, #tpu.memory_space<vmem>>, vector<16x1xf32>
    tpu.vector_store %arg9[%c0_12, %c0_13], %21 {strides = array<i32>} : memref<16x1xf32, #tpu.memory_space<vmem>>, vector<16x1xf32>,
    %c0_14 = arith.constant 0 : index
    %c0_15 = arith.constant 0 : index
    %23 = vector.load %arg7[%c0_14, %c0_15] : memref<16x1xf32, #tpu.memory_space<vmem>>, vector<16x1xf32>
    %cst_16 = arith.constant dense<0xFF800000> : vector<16xf32>
    %24 = vector.multi_reduction <maximumf>, %8, %cst_16 [1] : vector<16x256xf32> to vector<16xf32>
    %25 = vector.shape_cast %24 : vector<16xf32> to vector<16x1xf32>
    %26 = arith.maximumf %23, %25 : vector<16x1xf32>
    %27 = arith.subf %23, %26 : vector<16x1xf32>
    %28 = math.exp %27 : vector<16x1xf32>
    %c0_17 = arith.constant 0 : index
    %c0_18 = arith.constant 0 : index
    %29 = vector.load %arg8[%c0_17, %c0_18] : memref<16x1xf32, #tpu.memory_space<vmem>>, vector<16x1xf32>
    %30 = arith.mulf %28, %29 : vector<16x1xf32>
    %31 = vector.broadcast %26 : vector<16x1xf32> to vector<16x256xf32>
    %32 = arith.subf %8, %31 : vector<16x256xf32>
    %33 = math.exp %32 : vector<16x256xf32>
    %cst_19 = arith.constant dense<0.000000e+00> : vector<16xf32>
    %34 = vector.multi_reduction <add>, %33, %cst_19 [1] : vector<16x256xf32> to vector<16xf32>
    %35 = vector.shape_cast %34 : vector<16xf32> to vector<16x1xf32>
    %36 = arith.addf %30, %35 : vector<16x1xf32>
    %c0_20 = arith.constant 0 : index
    %c0_21 = arith.constant 0 : index
    %37 = vector.load %arg8[%c0_20, %c0_21] : memref<16x1xf32, #tpu.memory_space<vmem>>, vector<16x1xf32>
    tpu.vector_store %arg8[%c0_20, %c0_21], %36 {strides = array<i32>} : memref<16x1xf32, #tpu.memory_space<vmem>>, vector<16x1xf32>,
    %c0_22 = arith.constant 0 : index
    %c0_23 = arith.constant 0 : index
    %38 = vector.load %arg7[%c0_22, %c0_23] : memref<16x1xf32, #tpu.memory_space<vmem>>, vector<16x1xf32>
    tpu.vector_store %arg7[%c0_22, %c0_23], %26 {strides = array<i32>} : memref<16x1xf32, #tpu.memory_space<vmem>>, vector<16x1xf32>,
    %c0_i32_24 = arith.constant 0 : i32
    %39 = arith.cmpi eq, %arg1, %c0_i32_24 : i32
    %40 = arith.extui %39 : i1 to i32
    %c0_i32_25 = arith.constant 0 : i32
    %41 = arith.cmpi ne, %40, %c0_i32_25 : i32
    scf.if %41 {
      %c0_26 = arith.constant 0 : index
      %c0_27 = arith.constant 0 : index
      %42 = vector.load %arg7[%c0_26, %c0_27] : memref<16x1xf32, #tpu.memory_space<vmem>>, vector<16x1xf32>
      %c0_28 = arith.constant 0 : index
      %c0_29 = arith.constant 0 : index
      %43 = vector.load %arg8[%c0_28, %c0_29] : memref<16x1xf32, #tpu.memory_space<vmem>>, vector<16x1xf32>
      %44 = math.log %43 : vector<16x1xf32>
      %45 = arith.addf %42, %44 : vector<16x1xf32>
      %c0_30 = arith.constant 0 : index
      %c0_31 = arith.constant 0 : index
      %46 = vector.load %arg9[%c0_30, %c0_31] : memref<16x1xf32, #tpu.memory_space<vmem>>, vector<16x1xf32>
      %47 = arith.subf %45, %46 : vector<16x1xf32>
      %48 = tpu.iota {dimensions = array<i32: 0>} : vector<16x1xi32>
      %c16_i32 = arith.constant 16 : i32
      %49 = arith.muli %arg0, %c16_i32 : i32
      %50 = vector.broadcast %49 : i32 to vector<16x1xi32>
      %51 = arith.addi %48, %50 : vector<16x1xi32>
      %c16_i32_32 = arith.constant 16 : i32
      %52 = vector.broadcast %c16_i32_32 : i32 to vector<16x1xi32>
      %53 = arith.cmpi slt, %51, %52 : vector<16x1xi32>
      %c8_i32 = arith.constant 8 : i32
      %c0_i32_33 = arith.constant 0 : i32
      %54 = arith.cmpi eq, %c8_i32, %c0_i32_33 : i32
      %c1_i32 = arith.constant 1 : i32
      %55 = arith.select %54, %c1_i32, %c8_i32 : i32
      %56 = vector.broadcast %55 : i32 to vector<16x1xi32>
      %57 = arith.remsi %51, %56 : vector<16x1xi32>
      %c0_i32_34 = arith.constant 0 : i32
      %58 = vector.broadcast %c0_i32_34 : i32 to vector<16x1xi32>
      %59 = arith.cmpi ne, %57, %58 : vector<16x1xi32>
      %c0_i32_35 = arith.constant 0 : i32
      %60 = vector.broadcast %c0_i32_35 : i32 to vector<16x1xi32>
      %61 = arith.cmpi slt, %57, %60 : vector<16x1xi32>
      %c0_i32_36 = arith.constant 0 : i32
      %62 = arith.cmpi slt, %55, %c0_i32_36 : i32
      %63 = vector.broadcast %62 : i1 to vector<16x1xi1>
      %64 = vector.broadcast %63 : vector<16x1xi1> to vector<16x1xi1>
      %65 = arith.xori %61, %64 : vector<16x1xi1>
      %66 = arith.andi %65, %59 : vector<16x1xi1>
      %67 = vector.broadcast %55 : i32 to vector<16x1xi32>
      %68 = arith.addi %57, %67 : vector<16x1xi32>
      %69 = arith.select %66, %68, %57 : vector<16x1xi1>, vector<16x1xi32>
      %c7_i32 = arith.constant 7 : i32
      %70 = vector.broadcast %c7_i32 : i32 to vector<16x1xi32>
      %71 = arith.cmpi ne, %69, %70 : vector<16x1xi32>
      %72 = arith.andi %53, %71 : vector<16x1xi1>
      %cst_37 = arith.constant 0.000000e+00 : f32
      %73 = vector.broadcast %cst_37 : f32 to vector<16x1xf32>
      %74 = arith.select %72, %47, %73 : vector<16x1xi1>, vector<16x1xf32>
      %75 = vector.shape_cast %74 : vector<16x1xf32> to vector<16x1xf32>
      %76 = vector.broadcast %75 : vector<16x1xf32> to vector<16x128xf32>
      %c0_38 = arith.constant 0 : index
      %c0_39 = arith.constant 0 : index
      %77 = vector.load %arg6[%c0_38, %c0_39] : memref<16x128xf32, #tpu.memory_space<vmem>>, vector<16x128xf32>
      tpu.vector_store %arg6[%c0_38, %c0_39], %76 {strides = array<i32>} : memref<16x128xf32, #tpu.memory_space<vmem>>, vector<16x128xf32>,
    } else {
    }
    return
  }
  func.func @transform_0(%arg0: i32, %arg1: i32) -> (i32, i32) {
    %c0_i32 = arith.constant 0 : i32
    %c0_i32_0 = arith.constant 0 : i32
    return %arg0, %c0_i32 : i32, i32
  }
  func.func @transform_1(%arg0: i32, %arg1: i32) -> (i32, i32) {
    %c0_i32 = arith.constant 0 : i32
    %c0_i32_0 = arith.constant 0 : i32
    return %c0_i32, %arg1 : i32, i32
  }
  func.func @transform_2(%arg0: i32, %arg1: i32) -> (i32, i32) {
    %c0_i32 = arith.constant 0 : i32
    %c0_i32_0 = arith.constant 0 : i32
    return %c0_i32, %arg1 : i32, i32
  }
  func.func @transform_3(%arg0: i32, %arg1: i32) -> (i32, i32) {
    %c0_i32 = arith.constant 0 : i32
    %c0_i32_0 = arith.constant 0 : i32
    return %arg0, %c0_i32 : i32, i32
  }
  func.func @transform_4(%arg0: i32, %arg1: i32) -> (i32, i32) {
    %c0_i32 = arith.constant 0 : i32
    %c0_i32_0 = arith.constant 0 : i32
    return %arg0, %c0_i32 : i32, i32
  }
}

</mosaic_0001>

<bundles_post_ra>
// kernel: training_module_forward.2
= control target key start
LH: loop header
LB: loop body
LE: loop exit
PB: predicated region body
PF: predicated region fallthrough
CT: control target
= control target key end

     0   :  { %v230_v0 = vmov 0.0   ;;  %vm231_vm0 = vmmov 0   ;;  %s285_s1 = inlined_call_operand.vmem [shape: bf16[128,128], index: 1, kind: input, shape index: {}]   ;;  %s286_s0 = inlined_call_operand.vmem [shape: bf16[16,128], index: 0, kind: input, shape index: {}]   ;;  %s287_s2 = inlined_call_operand.vmem [shape: f32[1,128], index: 2, kind: input, shape index: {}]   ;;  %s288_s3 = inlined_call_operand.vmem [shape: bf16[16,128], index: 3, kind: output, shape index: {}]  }
   0x1   :  { %195 = vmatprep.subr.bf16.mxu0 %v230_v0  ;;  %v217_v1 = vld [vmem:[%s285_s1] sm:$0xff]   ;;  %211 = vmatprep.mubr.msk.bf16.mxu0 %vm231_vm0, %v230_v0  ;;  %v218_v2 = vld [vmem:[%s285_s1 + $0x8] sm:$0xff]   ;;  %v219_v3 = vld [vmem:[%s285_s1 + $0x10] sm:$0xff]  }
   0x2   :  { %196 = vmatpush3.bf16.msra.mxu0 %v217_v1  ;;  %v220_v4 = vld [vmem:[%s285_s1 + $0x18] sm:$0xff]   ;;  %v221_v5 = vld [vmem:[%s285_s1 + $0x20] sm:$0xff]   ;;  %v222_v6 = vld [vmem:[%s285_s1 + $0x28] sm:$0xff]  }
   0x3   :  { %197 = vmatprep.subr.bf16.mxu0 %v230_v0  ;;  %v223_v7 = vld [vmem:[%s285_s1 + $0x30] sm:$0xff]   ;;  %v224_v8 = vld [vmem:[%s285_s1 + $0x38] sm:$0xff]   ;;  %v225_v9 = vld [vmem:[%s286_s0] sm:$0xff]  }
   0x4   :  { %v167_v10 = vld [vmem:[%s287_s2] ss:$0 sm:$0xff] }
   0x6   :  { %198 = vmatpush3.bf16.msra.mxu0 %v218_v2 }
   0x7   :  { %199 = vmatprep.subr.bf16.mxu0 %v230_v0 }
   0xa   :  { %200 = vmatpush3.bf16.msra.mxu0 %v219_v3 }
   0xb   :  { %201 = vmatprep.subr.bf16.mxu0 %v230_v0 }
   0xe   :  { %202 = vmatpush3.bf16.msra.mxu0 %v220_v4 }
   0xf   :  { %203 = vmatprep.subr.bf16.mxu0 %v230_v0 }
  0x12   :  { %204 = vmatpush3.bf16.msra.mxu0 %v221_v5 }
  0x13   :  { %205 = vmatprep.subr.bf16.mxu0 %v230_v0 }
  0x16   :  { %206 = vmatpush3.bf16.msra.mxu0 %v222_v6 }
  0x17   :  { %207 = vmatprep.subr.bf16.mxu0 %v230_v0 }
  0x1a   :  { %208 = vmatpush3.bf16.msra.mxu0 %v223_v7 }
  0x1b   :  { %209 = vmatprep.subr.bf16.mxu0 %v230_v0 }
  0x1e   :  { %210 = vmatpush3.bf16.msra.mxu0 %v224_v8 }
  0x21   :  { %212 = vmatmul.mubr.bf16.vlgmr.msra.gmra.mrb[0].mxu0 %v225_v9 }
  0xf4   :  { %v128_v11 = vpop.f32.mrb[0].mxu0 }
  0xf5   :  { %v129_v12 = vadd.f32 %v167_v10, %v128_v11  ;;  %v213_v13 = vpop.f32.mrb[1].mxu0 }
  0xf6   :  { %v131_v14 = vpop.f32.mrb[2].mxu0 }
  0xf7   :  { %v135_v15 = vmul.f32 %v129_v12, %v129_v12  ;;  %v132_v16 = vadd.f32 %v167_v10, %v131_v14  ;;  %v214_v17 = vpop.f32.mrb[3].mxu0 }
  0xf9   :  { %v137_v18 = vmul.f32 %v135_v15, %v129_v12  ;;  %v136_v19 = vmul.f32 %v132_v16, %v132_v16 }
  0xfb   :  { %v139_v20 = vmul.f32 0.044715, %v137_v18  ;;  %v138_v21 = vmul.f32 %v136_v19, %v132_v16 }
  0xfd   :  { %v141_v22 = vadd.f32 %v139_v20, %v129_v12  ;;  %v140_v23 = vmul.f32 0.044715, %v138_v21 }
  0xff   :  { %v143_v24 = vmul.f32 0.7978846, %v141_v22  ;;  %v142_v25 = vadd.f32 %v140_v23, %v132_v16 }
 0x101   :  { %226 = vtanh.f32 %v143_v24  ;;  %v144_v26 = vmul.f32 0.7978846, %v142_v25 }
 0x103   :  { %228 = vtanh.f32 %v144_v26 }
 0x10b   :  { %v227_v27 = vpop.eup %226 }
 0x10c   :  { %v147_v28 = vadd.f32 1.0, %v227_v27 }
 0x10d   :  { %v229_v29 = vpop.eup %228 }
 0x10e   :  { %v149_v30 = vmul.f32 0.5, %v147_v28  ;;  %v148_v31 = vadd.f32 1.0, %v229_v29 }
 0x110   :  { %v150_v32 = vmul.f32 0.5, %v148_v31  ;;  %v151_v33 = vmul.f32 %v149_v30, %v129_v12 }
 0x112   :  { %v152_v34 = vmul.f32 %v150_v32, %v132_v16 }
 0x114   :  { %v184_v35 = vpack.c.bf16 %v152_v34, %v151_v33 }
 0x116   :  { %185 = vst [vmem:[%s288_s3] sm:$0xff] %v184_v35  }

// kernel: training_module_forward.3
= control target key start
LH: loop header
LB: loop body
LE: loop exit
PB: predicated region body
PF: predicated region fallthrough
CT: control target
= control target key end

     0   :  { %v413_v1 = vmov 0   ;;  %vm22_vm0 = vcmask 7168   ;;  %v414_v18 = vmov -inf   ;;  %v49_v19 = vlaneseq  ;;  %s525_s1 = inlined_call_operand.vmem [shape: bf16[128,256], index: 1, kind: input, shape index: {}]   ;;  %s526_s0 = inlined_call_operand.vmem [shape: bf16[16,128], index: 0, kind: input, shape index: {}]   ;;  %s527_s2 = inlined_call_operand.vmem [shape: f32[1,256], index: 2, kind: input, shape index: {}]   ;;  %s528_s3 = inlined_call_operand.vmem [shape: s32[16,1], index: 3, kind: input, shape index: {}]   ;;  %s529_s4 = inlined_call_operand.vmem [shape: f32[16,128], index: 4, kind: output, shape index: {}]  }
   0x1   :  { %v372_v0 = vld [vmem:[%s525_s1 + $0x4] ss:$8 sps:$4 sm:$0xff]   ;;  %177 = vmatprep.mubr.bf16.mxu0 %v413_v1  ;;  %371 = vset.pattern.permute.xlu0 %v413_v1  ;;  %v374_v2 = vld [vmem:[%s525_s1] ss:$8 sps:$4 sm:$0xff]   ;;  %v375_v3 = vld [vmem:[%s525_s1 + $0x14] ss:$8 sps:$4 sm:$0xff]  }
   0x2   :  { %370 = vset.pattern.permute.xlu1 %v413_v1  ;;  %145 = vmatprep.subr.bf16.mxu0 %v372_v0  ;;  %v377_v4 = vld [vmem:[%s525_s1 + $0x10] ss:$8 sps:$4 sm:$0xff]   ;;  %v378_v5 = vld [vmem:[%s525_s1 + $0x24] ss:$8 sps:$4 sm:$0xff]   ;;  %v380_v6 = vld [vmem:[%s525_s1 + $0x20] ss:$8 sps:$4 sm:$0xff]  }
   0x3   :  { %146 = vmatpush1.bf16.msra.mxu0 %v374_v2  ;;  %v381_v7 = vld [vmem:[%s525_s1 + $0x34] ss:$8 sps:$4 sm:$0xff]   ;;  %v383_v8 = vld [vmem:[%s525_s1 + $0x30] ss:$8 sps:$4 sm:$0xff]   ;;  %v384_v9 = vld [vmem:[%s525_s1 + $0x44] ss:$8 sps:$4 sm:$0xff]  }
   0x4   :  { %147 = vmatprep.subr.bf16.mxu0 %v375_v3  ;;  %v386_v10 = vld [vmem:[%s525_s1 + $0x40] ss:$8 sps:$4 sm:$0xff]   ;;  %v387_v11 = vld [vmem:[%s525_s1 + $0x54] ss:$8 sps:$4 sm:$0xff]   ;;  %v389_v12 = vld [vmem:[%s525_s1 + $0x50] ss:$8 sps:$4 sm:$0xff]  }
   0x5   :  { %v390_v13 = vld [vmem:[%s525_s1 + $0x64] ss:$8 sps:$4 sm:$0xff]   ;;  %v392_v14 = vld [vmem:[%s525_s1 + $0x60] ss:$8 sps:$4 sm:$0xff]   ;;  %v393_v15 = vld [vmem:[%s525_s1 + $0x74] ss:$8 sps:$4 sm:$0xff]  }
   0x6   :  { %v395_v16 = vld [vmem:[%s525_s1 + $0x70] ss:$8 sps:$4 sm:$0xff]   ;;  %v396_v17 = vld [vmem:[%s526_s0] sm:$0xff]   ;;  %23 = vst.msk [vmem:[#allocation2] sm:$0xff] %vm22_vm0, %v414_v18  ;;  %24 = vst.msk [vmem:[#allocation2 + $0x8] sm:$0xff] %vm22_vm0, %v414_v18  ;;  %v494_v20 = vshrl.u32 %v49_v19, 7 }
   0x7   :  { %148 = vmatpush1.bf16.msra.mxu0 %v377_v4  ;;  %v47_v22 = vld [vmem:[%s527_s2] sm:$0x3]  ;;  %v415_v37 = vmov 0.0   ;;  %v189_v45 = vand.u32 127, %v49_v19  ;;  %v198_v47 = vld [vmem:[%s528_s3 + $0x8] sm:$0xff] }
   0x8   :  { %149 = vmatprep.subr.bf16.mxu0 %v378_v5  ;;  %v51_v21 = vsub.s32 0, %v494_v20  ;;  %v55_v23 = vsub.s32 1, %v494_v20  ;;  %v197_v36 = vld [vmem:[%s528_s3] sm:$0xff]  ;;  %27 = vst.msk [vmem:[#allocation4] sm:$0xff] %vm22_vm0, %v415_v37  ;;  %25 = vst.msk [vmem:[#allocation3] sm:$0xff] %vm22_vm0, %v415_v37 }
   0x9   :  { %26 = vst.msk [vmem:[#allocation3 + $0x8] sm:$0xff] %vm22_vm0, %v415_v37  ;;  %28 = vst.msk [vmem:[#allocation4 + $0x8] sm:$0xff] %vm22_vm0, %v415_v37  ;;  %v190_v48 = vadd.s32 128, %v189_v45 }
   0xa   :  { %v52_v24 = vrot.slane %v47_v22, %v51_v21  ;;  %v56_v25 = vrot.slane %v47_v22, %v55_v23 }
   0xb   :  { %150 = vmatpush1.bf16.msra.mxu0 %v380_v6 }
   0xc   :  { %151 = vmatprep.subr.bf16.mxu0 %v381_v7 }
   0xd   :  { %v224_v38 = vld [vmem:[#allocation2] sm:$0xff]  ;;  %v225_v41 = vld [vmem:[#allocation2 + $0x8] sm:$0xff] }
   0xf   :  { %152 = vmatpush1.bf16.msra.mxu0 %v383_v8 }
  0x10   :  { %153 = vmatprep.subr.bf16.mxu0 %v384_v9  ;;  %v195_v9 = vld [vmem:[#allocation4] sm:$0xff]  ;;  %v241_v19 = vld [vmem:[#allocation3 + $0x8] sm:$0xff] }
  0x13   :  { %154 = vmatpush1.bf16.msra.mxu0 %v386_v10 }
  0x14   :  { %155 = vmatprep.subr.bf16.mxu0 %v387_v11 }
  0x17   :  { %156 = vmatpush1.bf16.msra.mxu0 %v389_v12 }
  0x18   :  { %157 = vmatprep.subr.bf16.mxu0 %v390_v13 }
  0x1b   :  { %158 = vmatpush1.bf16.msra.mxu0 %v392_v14 }
  0x1c   :  { %159 = vmatprep.subr.bf16.mxu0 %v393_v15  ;;  %v240_v15 = vld [vmem:[#allocation3] sm:$0xff] }
  0x1f   :  { %160 = vmatpush1.bf16.msra.mxu0 %v395_v16 }
  0x22   :  { %178 = vmatmul.mubr.bf16.vlgmr.msra.gmra.mrb[0].mxu0 %v396_v17 }
  0xf5   :  { %v179_v26 = vpop.f32.mrb[0].mxu0 }
  0xf6   :  { %v180_v27 = vadd.f32 %v179_v26, %v52_v24  ;;  %v181_v28 = vpop.f32.mrb[1].mxu0 }
  0xf7   :  { %v182_v29 = vadd.f32 %v181_v28, %v56_v25  ;;  %v183_v30 = vpop.f32.mrb[2].mxu0 }
  0xf8   :  { %v185_v31 = vpop.f32.mrb[3].mxu0  ;;  %v184_v32 = vadd.f32 %v183_v30, %v52_v24 }
  0xf9   :  { %v186_v33 = vadd.f32 %v185_v31, %v56_v25  ;;  %v226_v34 = vmax.f32 %v180_v27, %v182_v29  ;;  %v196_v25 = vld [vmem:[#allocation4 + $0x8] sm:$0xff]  ;;  %v308_v31 = vand.u32 7, %v494_v20 }
  0xfb   :  { %227 = vmax.xlane.f32.xlu0 %v226_v34  ;;  %v229_v35 = vmax.f32 %v184_v32, %v186_v33  ;;  %vm328_vm5 = vcmp.ne.s32.totalorder %v308_v31, 7 }
  0xff   :  { %230 = vmax.xlane.f32.xlu0 %v229_v35 }
 0x115   :  { %200 = vperm.xlu0 %371, %v197_v36  }
 0x188   :  { %v228_v39 = vpop.xlane.xlu0 %227 }
 0x189   :  { %v232_v40 = vmax.f32 %v224_v38, %v228_v39 }
 0x18b   :  { %v234_v42 = vsub.f32 %v224_v38, %v232_v40  ;;  %276 = vst.msk [vmem:[#allocation2] sm:$0xff] %vm22_vm0, %v232_v40  ;;  %246 = vperm.xlu1 %370, %v232_v40  }
 0x18c   :  { %v231_v43 = vpop.xlane.xlu0 %230 }
 0x18d   :  { %v233_v44 = vmax.f32 %v225_v41, %v231_v43  ;;  %v236_v12 = vmul.f32 1.442695, %v234_v42 }
 0x18f   :  { %v235_v46 = vsub.f32 %v225_v41, %v233_v44  ;;  %277 = vst.msk [vmem:[#allocation2 + $0x8] sm:$0xff] %vm22_vm0, %v233_v44  ;;  %251 = vperm.xlu1 %370, %v233_v44  }
 0x191   :  { %v238_v13 = vmul.f32 1.442695, %v235_v46 }
 0x192   :  { %v281_v34 = vld [vmem:[#allocation2] sm:$0xff] }
 0x193   :  { %203 = vperm.xlu1 %370, %v198_v47  }
 0x194   :  { %v201_v49 = vpop.permute.xlu0 %200 }
 0x195   :  { %vm205_vm1 = vcmp.eq.s32.totalorder %v189_v45, %v201_v49  ;;  %vm206_vm2 = vcmp.eq.s32.totalorder %v190_v48, %v201_v49 }
 0x196   :  { %v209_v50 = vsel %vm205_vm1, %v180_v27, 0.0  ;;  %v210_v51 = vsel %vm206_vm2, %v182_v29, 0.0  ;;  %v282_v41 = vld [vmem:[#allocation2 + $0x8] sm:$0xff] }
 0x197   :  { %v213_v52 = vadd.f32 %v210_v51, %v209_v50 }
 0x199   :  { %214 = vadd.xlane.f32.xlu0 %v213_v52 }
 0x20a   :  { %v247_v53 = vpop.permute.xlu1 %246 }
 0x20b   :  { %v254_v54 = vsub.f32 %v180_v27, %v247_v53  ;;  %v255_v55 = vsub.f32 %v182_v29, %v247_v53 }
 0x20d   :  { %v258_v56 = vmul.f32 1.442695, %v254_v54  ;;  %v260_v57 = vmul.f32 1.442695, %v255_v55 }
 0x20e   :  { %v252_v58 = vpop.permute.xlu1 %251 }
 0x20f   :  { %397 = vpow2.f32 %v258_v56  ;;  %v256_v59 = vsub.f32 %v184_v32, %v252_v58  ;;  %v257_v60 = vsub.f32 %v186_v33, %v252_v58 }
 0x210   :  { %399 = vpow2.f32 %v260_v57 }
 0x211   :  { %v262_v61 = vmul.f32 1.442695, %v256_v59  ;;  %v264_v62 = vmul.f32 1.442695, %v257_v60 }
 0x212   :  { %v204_v1 = vpop.permute.xlu1 %203 }
 0x213   :  { %401 = vpow2.f32 %v262_v61  ;;  %vm207_vm3 = vcmp.eq.s32.totalorder %v189_v45, %v204_v1  ;;  %vm208_vm4 = vcmp.eq.s32.totalorder %v190_v48, %v204_v1 }
 0x214   :  { %403 = vpow2.f32 %v264_v62  ;;  %v211_v6 = vsel %vm207_vm3, %v184_v32, 0.0  ;;  %v212_v7 = vsel %vm208_vm4, %v186_v33, 0.0  ;;  %v297_v32 = vadd.s32 8, %v494_v20 }
 0x215   :  { %v216_v8 = vadd.f32 %v212_v7, %v211_v6  ;;  %405 = vpow2.f32 %v236_v12 }
 0x216   :  { %407 = vpow2.f32 %v238_v13  ;;  %v315_v38 = vand.u32 7, %v297_v32 }
 0x218   :  { %vm329_vm6 = vcmp.ne.s32.totalorder %v315_v38, 7 }
 0x219   :  { %v398_v63 = vpop.eup %397 }
 0x21a   :  { %v400_v0 = vpop.eup %399 }
 0x21b   :  { %v266_v2 = vadd.f32 %v400_v0, %v398_v63 }
 0x21d   :  { %v402_v3 = vpop.eup %401  ;;  %267 = vadd.xlane.f32.xlu1 %v266_v2 }
 0x21e   :  { %v404_v4 = vpop.eup %403 }
 0x21f   :  { %v269_v5 = vadd.f32 %v404_v4, %v402_v3  ;;  %v406_v14 = vpop.eup %405 }
 0x220   :  { %v242_v16 = vmul.f32 %v406_v14, %v240_v15  ;;  %v408_v17 = vpop.eup %407 }
 0x221   :  { %270 = vadd.xlane.f32.xlu1 %v269_v5  ;;  %v243_v22 = vmul.f32 %v408_v17, %v241_v19 }
 0x225   :  { %217 = vadd.xlane.f32.xlu1 %v216_v8 }
 0x226   :  { %v215_v10 = vpop.xlane.xlu0 %214 }
 0x227   :  { %v219_v11 = vadd.f32 %v215_v10, %v195_v9 }
 0x229   :  { %222 = vst.msk [vmem:[#allocation4] sm:$0xff] %vm22_vm0, %v219_v11 }
 0x230   :  { %v291_v37 = vld [vmem:[#allocation4] sm:$0xff] }
 0x2aa   :  { %v268_v18 = vpop.xlane.xlu1 %267 }
 0x2ab   :  { %v272_v21 = vadd.f32 %v268_v18, %v242_v16 }
 0x2ad   :  { %274 = vst.msk [vmem:[#allocation3] sm:$0xff] %vm22_vm0, %v272_v21 }
 0x2ae   :  { %v271_v23 = vpop.xlane.xlu1 %270 }
 0x2af   :  { %v273_v24 = vadd.f32 %v271_v23, %v243_v22 }
 0x2b1   :  { %275 = vst.msk [vmem:[#allocation3 + $0x8] sm:$0xff] %vm22_vm0, %v273_v24 }
 0x2b2   :  { %v218_v26 = vpop.xlane.xlu1 %217 }
 0x2b3   :  { %v220_v27 = vadd.f32 %v218_v26, %v196_v25 }
 0x2b4   :  { %v283_v28 = vld [vmem:[#allocation3] sm:$0xff] }
 0x2b5   :  { %223 = vst.msk [vmem:[#allocation4 + $0x8] sm:$0xff] %vm22_vm0, %v220_v27  ;;  %409 = vlog2.f32 %v283_v28 }
 0x2b8   :  { %v284_v29 = vld [vmem:[#allocation3 + $0x8] sm:$0xff] }
 0x2b9   :  { %411 = vlog2.f32 %v284_v29 }
 0x2bc   :  { %v292_v44 = vld [vmem:[#allocation4 + $0x8] sm:$0xff] }
 0x2bf   :  { %v410_v30 = vpop.eup %409 }
 0x2c0   :  { %v286_v33 = vmul.f32 0.6931472, %v410_v30 }
 0x2c2   :  { %v289_v35 = vadd.f32 %v286_v33, %v281_v34 }
 0x2c3   :  { %v412_v36 = vpop.eup %411 }
 0x2c4   :  { %v293_v39 = vsub.f32 %v289_v35, %v291_v37  ;;  %v288_v40 = vmul.f32 0.6931472, %v412_v36 }
 0x2c6   :  { %v332_v42 = vsel %vm328_vm5, %v293_v39, 0.0  ;;  %v290_v43 = vadd.f32 %v288_v40, %v282_v41 }
 0x2c7   :  { %336 = vperm.xlu1 %370, %v332_v42  }
 0x2c8   :  { %v294_v45 = vsub.f32 %v290_v43, %v292_v44 }
 0x2ca   :  { %v333_v46 = vsel %vm329_vm6, %v294_v45, 0.0 }
 0x2cb   :  { %341 = vperm.xlu1 %370, %v333_v46  }
 0x346   :  { %v337_v47 = vpop.permute.xlu1 %336 }
 0x347   :  { %344 = vst [vmem:[%s529_s4] sm:$0xff] %v337_v47 }
 0x34a   :  { %v342_v20 = vpop.permute.xlu1 %341 }
 0x34b   :  { %345 = vst [vmem:[%s529_s4 + $0x8] sm:$0xff] %v342_v20 }

</bundles_post_ra>
